<compile_context>
chip_gen: v6e
topology: v6e:2x2x1
jax: 0.10.0
libtpu: 0.0.40
codegen_flags: <defaults>
</compile_context>

<pallas_src>
import functools

import jax
import jax.numpy as jnp
from jax import lax
from jax.experimental import pallas as pl
from jax.experimental.pallas import tpu as pltpu


_NEG_BIG = -1e30          # class-axis pad value (acts as -inf for softmax)
_VMEM_LIMIT = 48 << 20    # > v5e/v6e scoped defaults, < v7x 64 MiB physical
_F32_TILE_TARGET = 4 << 20  # ~4 MiB of padded-f32 tile per (double-)buffer


def _round_up(x, m):
    return ((x + m - 1) // m) * m


def _round_down(x, m):
    return max(m, (x // m) * m)


# ---------------------------------------------------------------------------
# Kernels.  Both compute, per tile:
#   log_p = (x_target - max) - log(sum exp(x - max))     (stable logsumexp)
#   loss  = -alpha * (1 - exp(log_p))^gamma * log_p
# mask out-of-range rows of the ragged last tile, reduce to one scalar, and
# broadcast it into a lane-dense (1, 8, 128) output block.
# ---------------------------------------------------------------------------

def _focal_rowmajor_kernel(x_ref, t_ref, a_ref, out_ref, *, gamma, n_rows):
    """General-C layout: logits tile (TN, C), classes on the lane axis."""
    x = x_ref[...].astype(jnp.float32)        # (TN, C)
    t = t_ref[...]                            # (TN, 1) int32 targets
    alpha = a_ref[...]                        # (TN, 1) f32 per-row alpha
    tn = x.shape[0]

    m = jnp.max(x, axis=1, keepdims=True)                            # (TN, 1)
    # One-hot gather of the target logit from raw x (independent of x - m).
    col = lax.broadcasted_iota(jnp.int32, x.shape, 1)
    x_t = jnp.sum(jnp.where(col == t, x, 0.0), axis=1, keepdims=True)
    lse = jnp.log(jnp.sum(jnp.exp(x - m), axis=1, keepdims=True))    # (TN, 1)

    log_p = (x_t - m) - lse
    p_t = jnp.exp(log_p)
    one_minus = 1.0 - p_t
    if float(gamma).is_integer():     # default gamma=2 -> pure VPU multiplies
        focal = lax.integer_pow(one_minus, int(gamma))
    else:
        focal = jnp.exp(jnp.float32(gamma) * jnp.log1p(-p_t))

    per_row = -alpha * focal * log_p                                 # (TN, 1)

    # Mask rows of the ragged last tile (padded rows carry garbage data).
    row = pl.program_id(0) * tn + lax.broadcasted_iota(jnp.int32, (tn, 1), 0)
    per_row = jnp.where(row < n_rows, per_row, 0.0)

    out_ref[...] = jnp.full((1, 8, 128), jnp.sum(per_row), dtype=jnp.float32)


def _focal_lanemajor_kernel(x_ref, t_ref, a_ref, out_ref, *, gamma, n_rows):
    """Small-C layout: logits tile (C_pad, TN), examples on the lane axis."""
    x = x_ref[...].astype(jnp.float32)        # (C_pad, TN)
    t = t_ref[...]                            # (1, TN) int32 targets
    alpha = a_ref[...]                        # (1, TN) f32 per-example alpha
    tn = x.shape[1]

    m = jnp.max(x, axis=0, keepdims=True)                            # (1, TN)
    cls = lax.broadcasted_iota(jnp.int32, x.shape, 0)
    x_t = jnp.sum(jnp.where(cls == t, x, 0.0), axis=0, keepdims=True)
    lse = jnp.log(jnp.sum(jnp.exp(x - m), axis=0, keepdims=True))    # (1, TN)

    log_p = (x_t - m) - lse
    p_t = jnp.exp(log_p)
    one_minus = 1.0 - p_t
    if float(gamma).is_integer():
        focal = lax.integer_pow(one_minus, int(gamma))
    else:
        focal = jnp.exp(jnp.float32(gamma) * jnp.log1p(-p_t))

    loss = -alpha * focal * log_p                                    # (1, TN)

    # Mask lanes of the ragged last tile.
    colg = pl.program_id(0) * tn + lax.broadcasted_iota(jnp.int32, (1, tn), 1)
    loss = jnp.where(colg < n_rows, loss, 0.0)

    out_ref[...] = jnp.full((1, 8, 128), jnp.sum(loss), dtype=jnp.float32)


# ---------------------------------------------------------------------------
# Tile sizing.
# ---------------------------------------------------------------------------

def _pick_tile_rowmajor(n, c):
    """Rows per block for the (N, C) layout.

    Budget against the f32 in-kernel working set with the class axis padded to
    the 128-lane boundary (~2 double-buffered inputs + ~4 f32 temporaries
    ~= 6x the tile): a ~4 MiB padded-f32 tile keeps total VMEM ~24 MiB, well
    under the 48 MiB limit requested (and v7x's 64 MiB physical VMEM).
    """
    c_pad = _round_up(c, 128)
    rows = _F32_TILE_TARGET // (c_pad * 4)
    rows = int(min(max(rows, 8), 16384))
    if n >= 4096:
        # >= 4 grid steps: DMA/compute overlap + both v7x TensorCores busy.
        rows = min(rows, _round_up((n + 3) // 4, 8))
    rows = _round_down(rows, 8)
    return n if rows >= n else rows


def _pick_tile_lanemajor(n, c_pad):
    """Examples per block (lane axis) for the transposed (C_pad, N) layout."""
    cols = _F32_TILE_TARGET // (c_pad * 4)
    cols = int(min(max(cols, 128), 131072))
    if n >= 4096:
        cols = min(cols, _round_up((n + 3) // 4, 128))
    cols = _round_down(cols, 128)
    return n if cols >= n else cols


# ---------------------------------------------------------------------------
# Wrapper.
# ---------------------------------------------------------------------------

def focal_loss(inputs, targets, alpha=None, *, gamma=2.0, size_average=True,
               tile_n=None):
    """Focal loss via Pallas TPU kernels.

    inputs : (N, C) float (f32 or bf16) logits
    targets: (N,)   integer class ids in [0, C)
    alpha  : (C,) or (C, 1) per-class weights (default: ones)
    Returns a scalar float32 (mean over N if size_average, else sum).
    """
    N, C = inputs.shape

    if alpha is None:
        alpha = jnp.ones((C,), jnp.float32)
    alpha_flat = jnp.asarray(alpha, jnp.float32).reshape(-1)

    targets = jnp.asarray(targets).astype(jnp.int32)
    alpha_g = alpha_flat[targets]                    # (N,) wrapper-side gather

    # Small class counts: put examples on the 128-lane axis (lane-dense);
    # otherwise keep the natural row-major layout (no extra transpose pass).
    lane_major = C <= 32

    if lane_major:
        c_pad = _round_up(C, 8)
        x = jnp.swapaxes(inputs, 0, 1)               # (C, N)
        if c_pad != C:
            x = jnp.pad(x, ((0, c_pad - C), (0, 0)),
                        constant_values=jnp.asarray(_NEG_BIG, inputs.dtype))
        t2 = targets.reshape(1, N)
        a2 = alpha_g.reshape(1, N)

        if tile_n is None:
            tn = _pick_tile_lanemajor(N, c_pad)
        else:
            tn = _round_up(int(tile_n), 128)
            tn = N if tn >= N else tn
        grid_steps = -(-N // tn)

        kernel = functools.partial(_focal_lanemajor_kernel,
                                   gamma=float(gamma), n_rows=N)
        in_specs = [
            pl.BlockSpec((c_pad, tn), lambda i: (0, i)),   # logits (C_pad, TN)
            pl.BlockSpec((1, tn), lambda i: (0, i)),       # targets
            pl.BlockSpec((1, tn), lambda i: (0, i)),       # per-example alpha
        ]
        args = (x, t2, a2)
    else:
        t2 = targets.reshape(N, 1)
        a2 = alpha_g.reshape(N, 1)

        if tile_n is None:
            tn = _pick_tile_rowmajor(N, C)
        else:
            tn = _round_up(int(tile_n), 8)
            tn = N if tn >= N else tn
        grid_steps = -(-N // tn)

        kernel = functools.partial(_focal_rowmajor_kernel,
                                   gamma=float(gamma), n_rows=N)
        in_specs = [
            pl.BlockSpec((tn, C), lambda i: (i, 0)),       # logits (TN, C)
            pl.BlockSpec((tn, 1), lambda i: (i, 0)),       # targets
            pl.BlockSpec((tn, 1), lambda i: (i, 0)),       # per-row alpha
        ]
        args = (inputs, t2, a2)

    partials = pl.pallas_call(
        kernel,
        out_shape=jax.ShapeDtypeStruct((grid_steps, 8, 128), jnp.float32),
        grid_spec=pltpu.PrefetchScalarGridSpec(
            num_scalar_prefetch=0,
            grid=(grid_steps,),
            in_specs=in_specs,
            out_specs=pl.BlockSpec((1, 8, 128), lambda i: (i, 0, 0)),
        ),
        compiler_params=pltpu.CompilerParams(
            dimension_semantics=("parallel",),     # independent tiles
            vmem_limit_bytes=_VMEM_LIMIT),
    )(*args)

    total = jnp.sum(partials[:, 0, 0])
    return total / jnp.float32(N) if size_average else total


def focal_loss_ref(inputs, targets, alpha=None, *, gamma=2.0, size_average=True):
    """Pure-JAX reference matching the PyTorch module."""
    N, C = inputs.shape
    if alpha is None:
        alpha = jnp.ones((C,), jnp.float32)
    p = jax.nn.softmax(inputs.astype(jnp.float32), axis=1)
    mask = jax.nn.one_hot(targets, C, dtype=jnp.float32)
    probs = jnp.sum(p * mask, axis=1)
    alpha_g = jnp.asarray(alpha, jnp.float32).reshape(-1)[targets]
    bl = -alpha_g * jnp.power(1.0 - probs, gamma) * jnp.log(probs)
    return jnp.mean(bl) if size_average else jnp.sum(bl)


if __name__ == "__main__":
    key = jax.random.PRNGKey(0)

    # Case 1: module-spec shapes (lane-major path, C padded 4->8, one block),
    # default-style alpha = ones((C,1)), integer gamma, mean reduction.
    k1, k2 = jax.random.split(key)
    N, C = 8, 4
    inputs = jax.random.normal(k1, (N, C), dtype=jnp.float32)
    targets = jax.random.randint(k2, (N,), 0, C, dtype=jnp.int32)
    alpha = jnp.ones((C, 1), dtype=jnp.float32)

    loss = jax.block_until_ready(
        focal_loss(inputs, targets, alpha, gamma=2.0, size_average=True))
    ref = focal_loss_ref(inputs, targets, alpha, gamma=2.0, size_average=True)
    assert jnp.allclose(loss, ref, rtol=3e-5, atol=1e-5), (loss, ref)

    # Case 2: lane-major multi-tile path with a ragged last tile (masking),
    # bf16 logits, non-integer gamma, per-class alpha, sum reduction.
    k3, k4 = jax.random.split(k2)
    N2, C2 = 650, 8
    inputs2 = jax.random.normal(k3, (N2, C2), dtype=jnp.bfloat16)
    targets2 = jax.random.randint(k4, (N2,), 0, C2, dtype=jnp.int32)
    alpha2 = jnp.linspace(0.5, 1.5, C2, dtype=jnp.float32)

    loss2 = jax.block_until_ready(
        focal_loss(inputs2, targets2, alpha2, gamma=1.5,
                   size_average=False, tile_n=128))
    ref2 = focal_loss_ref(inputs2, targets2, alpha2, gamma=1.5,
                          size_average=False)
    assert jnp.allclose(loss2, ref2, rtol=3e-5, atol=1e-4), (loss2, ref2)

    # Case 3: row-major path (C > 32), multi-tile with ragged last tile.
    k5, k6 = jax.random.split(k4)
    N3, C3 = 44, 256
    inputs3 = jax.random.normal(k5, (N3, C3), dtype=jnp.float32)
    targets3 = jax.random.randint(k6, (N3,), 0, C3, dtype=jnp.int32)
    alpha3 = jnp.linspace(0.25, 2.0, C3, dtype=jnp.float32)

    loss3 = jax.block_until_ready(
        focal_loss(inputs3, targets3, alpha3, gamma=2.0,
                   size_average=True, tile_n=16))
    ref3 = focal_loss_ref(inputs3, targets3, alpha3, gamma=2.0,
                          size_average=True)
    assert jnp.allclose(loss3, ref3, rtol=3e-5, atol=1e-5), (loss3, ref3)

    print("KERNEL_OK")
</pallas_src>

<mosaic_0001>
module attributes {stable_mosaic.version = 11 : i64} {
  func.func @_focal_lanemajor_kernel(%arg0: i32, %arg1: memref<8x8xf32, #tpu.memory_space<vmem>>, %arg2: memref<1x8xi32, #tpu.memory_space<vmem>>, %arg3: memref<1x8xf32, #tpu.memory_space<vmem>>, %arg4: memref<1x8x128xf32, #tpu.memory_space<vmem>>) attributes {dimension_semantics = [#tpu.dimension_semantics<parallel>], iteration_bounds = array<i64: 1>, scalar_prefetch = 0 : i64, scratch_operands = 0 : i64, tpu.core_type = #tpu.core_type<tc>, window_params = [{transform_indices = @transform_0, window_bounds = array<i64: 8, 8>}, {transform_indices = @transform_1, window_bounds = array<i64: 1, 8>}, {transform_indices = @transform_2, window_bounds = array<i64: 1, 8>}, {transform_indices = @transform_3, window_bounds = array<i64: 1, 8, 128>}]} {
    %c0 = arith.constant 0 : index
    %c0_0 = arith.constant 0 : index
    %0 = vector.load %arg1[%c0, %c0_0] : memref<8x8xf32, #tpu.memory_space<vmem>>, vector<8x8xf32>
    %c0_1 = arith.constant 0 : index
    %c0_2 = arith.constant 0 : index
    %1 = vector.load %arg2[%c0_1, %c0_2] : memref<1x8xi32, #tpu.memory_space<vmem>>, vector<1x8xi32>
    %c0_3 = arith.constant 0 : index
    %c0_4 = arith.constant 0 : index
    %2 = vector.load %arg3[%c0_3, %c0_4] : memref<1x8xf32, #tpu.memory_space<vmem>>, vector<1x8xf32>
    %cst = arith.constant dense<0xFF800000> : vector<8xf32>
    %3 = vector.multi_reduction <maximumf>, %0, %cst [0] : vector<8x8xf32> to vector<8xf32>
    %4 = vector.shape_cast %3 : vector<8xf32> to vector<1x8xf32>
    %5 = tpu.iota {dimensions = array<i32: 0>} : vector<8x8xi32>
    %6 = vector.broadcast %1 : vector<1x8xi32> to vector<8x8xi32>
    %7 = arith.cmpi eq, %5, %6 : vector<8x8xi32>
    %cst_5 = arith.constant 0.000000e+00 : f32
    %8 = vector.broadcast %cst_5 : f32 to vector<8x8xf32>
    %9 = arith.select %7, %0, %8 : vector<8x8xi1>, vector<8x8xf32>
    %cst_6 = arith.constant dense<0.000000e+00> : vector<8xf32>
    %10 = vector.multi_reduction <add>, %9, %cst_6 [0] : vector<8x8xf32> to vector<8xf32>
    %11 = vector.shape_cast %10 : vector<8xf32> to vector<1x8xf32>
    %12 = vector.broadcast %4 : vector<1x8xf32> to vector<8x8xf32>
    %13 = arith.subf %0, %12 : vector<8x8xf32>
    %14 = math.exp %13 : vector<8x8xf32>
    %cst_7 = arith.constant dense<0.000000e+00> : vector<8xf32>
    %15 = vector.multi_reduction <add>, %14, %cst_7 [0] : vector<8x8xf32> to vector<8xf32>
    %16 = vector.shape_cast %15 : vector<8xf32> to vector<1x8xf32>
    %17 = math.log %16 : vector<1x8xf32>
    %18 = arith.subf %11, %4 : vector<1x8xf32>
    %19 = arith.subf %18, %17 : vector<1x8xf32>
    %20 = math.exp %19 : vector<1x8xf32>
    %cst_8 = arith.constant 1.000000e+00 : f32
    %21 = vector.broadcast %cst_8 : f32 to vector<1x8xf32>
    %22 = arith.subf %21, %20 : vector<1x8xf32>
    %23 = arith.mulf %22, %22 : vector<1x8xf32>
    %cst_9 = arith.constant 0.000000e+00 : f32
    %24 = vector.broadcast %cst_9 : f32 to vector<1x8xf32>
    %25 = arith.subf %24, %2 : vector<1x8xf32>
    %26 = arith.mulf %25, %23 : vector<1x8xf32>
    %27 = arith.mulf %26, %19 : vector<1x8xf32>
    %c8_i32 = arith.constant 8 : i32
    %28 = arith.muli %arg0, %c8_i32 : i32
    %29 = tpu.iota {dimensions = array<i32: 1>} : vector<1x8xi32>
    %30 = vector.broadcast %28 : i32 to vector<1x8xi32>
    %31 = arith.addi %30, %29 : vector<1x8xi32>
    %c8_i32_10 = arith.constant 8 : i32
    %32 = vector.broadcast %c8_i32_10 : i32 to vector<1x8xi32>
    %33 = arith.cmpi slt, %31, %32 : vector<1x8xi32>
    %cst_11 = arith.constant 0.000000e+00 : f32
    %34 = vector.broadcast %cst_11 : f32 to vector<1x8xf32>
    %35 = arith.select %33, %27, %34 : vector<1x8xi1>, vector<1x8xf32>
    %36 = vector.shape_cast %35 : vector<1x8xf32> to vector<1x1x8xf32>
    %cst_12 = arith.constant dense<0.000000e+00> : vector<1xf32>
    %37 = vector.multi_reduction <add>, %36, %cst_12 [1, 2] : vector<1x1x8xf32> to vector<1xf32>
    %38 = vector.shape_cast %37 : vector<1xf32> to vector<1x1x1xf32>
    %39 = vector.extract %38[0, 0, 0] : f32 from vector<1x1x1xf32>
    %40 = vector.broadcast %39 : f32 to vector<1x8x128xf32>
    %c0_13 = arith.constant 0 : index
    %c0_14 = arith.constant 0 : index
    %c0_15 = arith.constant 0 : index
    %41 = vector.load %arg4[%c0_13, %c0_14, %c0_15] : memref<1x8x128xf32, #tpu.memory_space<vmem>>, vector<1x8x128xf32>
    tpu.vector_store %arg4[%c0_13, %c0_14, %c0_15], %40 {strides = array<i32>} : memref<1x8x128xf32, #tpu.memory_space<vmem>>, vector<1x8x128xf32>,
    return
  }
  func.func @transform_0(%arg0: i32) -> (i32, i32) {
    %c0_i32 = arith.constant 0 : i32
    %c0_i32_0 = arith.constant 0 : i32
    return %c0_i32, %arg0 : i32, i32
  }
  func.func @transform_1(%arg0: i32) -> (i32, i32) {
    %c0_i32 = arith.constant 0 : i32
    %c0_i32_0 = arith.constant 0 : i32
    return %c0_i32, %arg0 : i32, i32
  }
  func.func @transform_2(%arg0: i32) -> (i32, i32) {
    %c0_i32 = arith.constant 0 : i32
    %c0_i32_0 = arith.constant 0 : i32
    return %c0_i32, %arg0 : i32, i32
  }
  func.func @transform_3(%arg0: i32) -> (i32, i32, i32) {
    %c0_i32 = arith.constant 0 : i32
    %c0_i32_0 = arith.constant 0 : i32
    %c0_i32_1 = arith.constant 0 : i32
    return %arg0, %c0_i32, %c0_i32_0 : i32, i32, i32
  }
}

</mosaic_0001>

<bundles_post_ra>
// kernel: tpu_custom_call.1
= control target key start
LH: loop header
LB: loop body
LE: loop exit
PB: predicated region body
PF: predicated region fallthrough
CT: control target
= control target key end

     0   :  { %8 = vsyncpa [#allocation3], 0  ;;  %s201_s0 = inlined_call_operand.hbm [shape: f32[8,8], index: 0, kind: input, shape index: {}]   ;;  %s202_s1 = inlined_call_operand.vmem [shape: s32[1,8], index: 1, kind: input, shape index: {}]   ;;  %s203_s2 = inlined_call_operand.vmem [shape: f32[1,8], index: 2, kind: input, shape index: {}]   ;;  %s204_s3 = inlined_call_operand.hbm [shape: f32[1,8,128], index: 3, kind: output, shape index: {}]  }
   0x1   :  { %9 = vsyncpa [#allocation4], 0  ;;  %s164_s12 = smov [#allocation2]  }
   0x2   :  { %s16_s13 = sshll.u32 %s164_s12, 4  ;;  %s17_s13 = int_to_ptr.vmem [resolvable:$true] %s16_s13 }
   0x3   :  { %s128_s14 = scalar_lea.vmem %s17_s13, 128  ;;  %p133_p1 = scmp.lt.s32.totalorder %s17_s13, %s17_s13 }
   0x4   :  { %p129_p0 = scmp.ne.s32.totalorder %s17_s13, %s128_s14  ;;  %p134_p2 = scmp.lt.s32.totalorder %s128_s14, %s128_s14 }
   0x6   :  { %p135_p3 = por %p134_p2, %p133_p1 }
   0x8   :  { %p136_p4 = pnand %p135_p3, %p129_p0 }
   0xa   :  { %139 = shalt.err (!%p136_p4)
}
   0xb   :  { %19 = dma.hbm_to_vmem [thread:$0]  %s201_s0, 128, %s17_s13, [#allocation3]  }
   0xc   :  { %160 = dma.done.wait [#allocation3], 128  }
   0xd   :  { %161 = vsyncadd [#allocation3], 4294967168  ;;  %vm30_vm0 = vcmask 64512   ;;  %v27_v0 = vld [vmem:[#allocation2] sm:$0xff]  ;;  %v38_v9 = vlaneseq  ;;  %vm81_vm3 = vcmask 57344  }
   0xe   :  { %v31_v1 = vsel %vm30_vm0, %v27_v0, -inf  ;;  %v109_v12 = vld [vmem:[%s202_s1] ss:$0 sm:$0xff] }
   0xf   :  { %v32_v2 = vrot.slane %v31_v1, 4  ;;  %v39_v11 = vshrl.u32 %v38_v9, 7  ;;  %v29_v34 = vld [vmem:[%s203_s2] sm:$0x1]  ;;  %v76_v38 = vand.u32 127, %v38_v9  ;;  %s165_s2 = smov [#allocation5]  }
  0x10   :  { %v71_v37 = vsub.f32 0.0, %v29_v34  ;;  %s100_s19 = sshll.u32 %s165_s2, 4  ;;  %s101_s19 = int_to_ptr.vmem [resolvable:$true] %s100_s19 }
  0x11   :  { %v33_v3 = vmax.f32 %v31_v1, %v32_v2  ;;  %vm44_vm1 = vcmp.eq.s32.totalorder %v39_v11, %v109_v12  ;;  %vm79_vm2 = vcmp.lt.s32.totalorder %v76_v38, 8  ;;  %s140_s21 = scalar_lea.vmem %s101_s19, 128  ;;  %p145_p6 = scmp.lt.s32.totalorder %s101_s19, %s101_s19 }
  0x12   :  { %v45_v13 = vsel %vm44_vm1, %v27_v0, 0.0  ;;  %p141_p5 = scmp.ne.s32.totalorder %s101_s19, %s140_s21  ;;  %p146_p7 = scmp.lt.s32.totalorder %s140_s21, %s140_s21 }
  0x13   :  { %v34_v4 = vrot.slane %v33_v3, 2  ;;  %v46_v14 = vsel %vm30_vm0, %v45_v13, 0.0 }
  0x14   :  { %v47_v17 = vrot.slane %v46_v14, 4  ;;  %p147_p8 = por %p146_p7, %p145_p6 }
  0x15   :  { %v35_v5 = vmax.f32 %v33_v3, %v34_v4 }
  0x16   :  { %v48_v20 = vadd.f32 %v47_v17, %v46_v14  ;;  %p148_p9 = pnand %p147_p8, %p141_p5 }
  0x17   :  { %v36_v6 = vrot.slane %v35_v5, 1 }
  0x18   :  { %v49_v23 = vrot.slane %v48_v20, 2 }
  0x19   :  { %v37_v7 = vmax.f32 %v35_v5, %v36_v6 }
  0x1a   :  { %v50_v26 = vadd.f32 %v49_v23, %v48_v20 }
  0x1b   :  { %v53_v8 = vsub.f32 %v27_v0, %v37_v7 }
  0x1c   :  { %v51_v27 = vrot.slane %v50_v26, 1 }
  0x1d   :  { %v54_v10 = vmul.f32 1.442695, %v53_v8 }
  0x1e   :  { %v52_v28 = vadd.f32 %v51_v27, %v50_v26 }
  0x1f   :  { %114 = vpow2.f32 %v54_v10 }
  0x20   :  { %v65_v29 = vsub.f32 %v52_v28, %v37_v7 }
  0x2c   :  { %v115_v15 = vpop.eup %114 }
  0x2d   :  { %v56_v16 = vsel %vm30_vm0, %v115_v15, 0.0 }
  0x2e   :  { %v57_v18 = vrot.slane %v56_v16, 4 }
  0x30   :  { %v58_v19 = vadd.f32 %v57_v18, %v56_v16 }
  0x32   :  { %v59_v21 = vrot.slane %v58_v19, 2 }
  0x34   :  { %v60_v22 = vadd.f32 %v59_v21, %v58_v19 }
  0x36   :  { %v61_v24 = vrot.slane %v60_v22, 1 }
  0x38   :  { %v62_v25 = vadd.f32 %v61_v24, %v60_v22 }
  0x3a   :  { %116 = vlog2.f32 %v62_v25 }
  0x47   :  { %v117_v30 = vpop.eup %116 }
  0x48   :  { %v64_v31 = vmul.f32 0.6931472, %v117_v30 }
  0x4a   :  { %v66_v32 = vsub.f32 %v65_v29, %v64_v31 }
  0x4c   :  { %v67_v33 = vmul.f32 1.442695, %v66_v32 }
  0x4e   :  { %118 = vpow2.f32 %v67_v33 }
  0x5b   :  { %v119_v35 = vpop.eup %118 }
  0x5c   :  { %v69_v36 = vsub.f32 1.0, %v119_v35 }
  0x5e   :  { %v70_v39 = vmul.f32 %v69_v36, %v69_v36 }
  0x60   :  { %v72_v40 = vmul.f32 %v71_v37, %v70_v39 }
  0x62   :  { %v73_v41 = vmul.f32 %v72_v40, %v66_v32 }
  0x64   :  { %v80_v42 = vsel %vm79_vm2, %v73_v41, 0.0 }
  0x65   :  { %v82_v43 = vsel %vm81_vm3, %v80_v42, 0.0 }
  0x66   :  { %83 = vadd.xlane.f32.xlu0 %v82_v43 }
  0xef   :  { %v84_v44 = vpop.xlane.xlu0 %83 }
  0xf0   :  { %v85_v45 = vrot.slane %v84_v44, 4 }
  0xf2   :  { %v86_v46 = vadd.f32 %v85_v45, %v84_v44 }
  0xf4   :  { %v87_v47 = vrot.slane %v86_v46, 2 }
  0xf6   :  { %v88_v48 = vadd.f32 %v87_v47, %v86_v46 }
  0xf8   :  { %v89_v49 = vrot.slane %v88_v48, 1 }
  0xfa   :  { %v90_v50 = vadd.f32 %v89_v49, %v88_v48 }
  0xfc   :  { %110 = vpush %v90_v50 }
 0x12d   :  { %s111_s20 = spop %110 }
 0x12e   :  { %v92_v51 = vstv %s111_s20 }
 0x12f   :  { %93 = vst [vmem:[#allocation5] sm:$0xff] %v92_v51 }
 0x130   :  { %151 = shalt.err (!%p148_p9)
}
 0x131   :  { %103 = dma.vmem_to_hbm [thread:$0]  %s101_s19, 128, %s204_s3, [#allocation4]  }
 0x132   :  { %162 = dma.done.wait [#allocation4], 128  }
 0x133   :  { %163 = vsyncadd [#allocation4], 4294967168 }
 0x134   :  { %107 = vsyncpa [#allocation3], 1 }
 0x135   :  { %108 = vsyncpa [#allocation4], 1 }

</bundles_post_ra>
